<compile_context>
chip_gen: v7x
topology: tpu7x:2x2x1
jax: 0.10.0
libtpu: 0.0.40
codegen_flags: <defaults>
</compile_context>

<pallas_src>
import functools
import math

import jax
import jax.numpy as jnp
from jax.experimental import pallas as pl
from jax.experimental.pallas import tpu as pltpu


_MIB = 1 << 20


def _device_kind():
    try:
        return jax.devices()[0].device_kind.lower()
    except Exception:
        return ""


def _vmem_capacity_bytes():
    try:
        cap = int(pltpu.get_tpu_info().vmem_capacity_bytes)
        if cap > 0:
            return cap
    except Exception:
        pass
    # v7x has 64 MiB per TensorCore; v5e/v6e have 128 MiB.
    return 64 * _MIB if "v7" in _device_kind() else 128 * _MIB


# Generation-aware budget: ~96 MiB on v5e/v6e, ~48 MiB on v7x.
_VMEM_BUDGET = int(0.75 * _vmem_capacity_bytes())


def _default_mxu_tile():
    kind = _device_kind()
    # v5e's MXU is 4x128^2 -> 128-wide N/K tiles already saturate it.
    if ("v5 lite" in kind) or ("v5e" in kind) or ("v5lite" in kind):
        return 128
    return 256


_MXU_TILE_PREF = _default_mxu_tile()


def _round_up(x, m):
    return ((x + m - 1) // m) * m


def _pick_tile(dim, pref, align):
    """Largest multiple of `align` that divides `dim` and is <= `pref`,
    otherwise the full dim (block == full array is always legal)."""
    if dim % align != 0 or dim <= align:
        return dim
    t = min(pref, dim)
    t -= t % align
    while t >= align:
        if dim % t == 0:
            return t
        t -= align
    return dim


def _vmem_limit(footprint_bytes):
    return int(min(_VMEM_BUDGET,
                   max(_round_up(footprint_bytes + 4 * _MIB, _MIB), 16 * _MIB)))


def _fused_plan(batch, layers, x_itemsize, out_itemsize, tm_pref):
    """Shared tile-plan + VMEM-footprint estimate for the fused path.

    layers: list of (w, b) with w: [din, dout] bf16, b: [1, dout] f32.
    Weights/biases are single-buffered (constant index_map, Buffered(1));
    only the x / out batch tiles are double-buffered.
    """
    tm_cap = tm_pref
    if batch >= 32:
        # Keep at least 2 grid iterations so "parallel" can feed both
        # TensorCores on v7x; harmless on single-TC v5e/v6e.
        tm_cap = max(16, min(tm_pref, batch // 2))
    tm = _pick_tile(batch, tm_cap, 16)

    resident = sum(int(w.size) * w.dtype.itemsize + int(b.size) * b.dtype.itemsize
                   for w, b in layers)                         # single-buffered
    d0 = layers[0][0].shape[0]
    dl = layers[-1][0].shape[1]
    dmax = max(max(w.shape) for w, _ in layers)
    streamed = 2 * tm * (d0 * x_itemsize + dl * out_itemsize)  # double-buffered
    temps = 4 * tm * dmax * 4                                  # live f32 temps
    return tm, resident + streamed + temps


# ---------------------------------------------------------------------------
# Path 1: fused whole-chain kernel (mixed widths allowed, weights VMEM-resident)
# ---------------------------------------------------------------------------
def _fused_chain_kernel(*refs, relu_flags):
    n_layers = len(relu_flags)
    x_ref = refs[0]
    o_ref = refs[-1]
    # Cast the activation to bf16 once; inter-layer activations stay on-chip.
    act = x_ref[...]
    if act.dtype != jnp.bfloat16:
        act = act.astype(jnp.bfloat16)
    for layer in range(n_layers):                       # static unroll
        w_ref = refs[1 + 2 * layer]                     # (din, dout) bf16
        b_ref = refs[2 + 2 * layer]                     # (1, dout)  f32
        acc = jnp.dot(act, w_ref[...], preferred_element_type=jnp.float32)
        acc = acc + b_ref[...].astype(jnp.float32)
        if relu_flags[layer]:
            acc = jnp.maximum(acc, 0.0)
        act = acc.astype(jnp.bfloat16) if layer < n_layers - 1 else acc
    o_ref[...] = act.astype(o_ref.dtype)


def fused_mlp(x, layers, relu_flags, *, tm_pref=512):
    """x: [B, D0]; layers: list of (w [din,dout] bf16, b [1,dout] f32)."""
    B, D0 = x.shape
    Dl = layers[-1][0].shape[1]
    tm, footprint = _fused_plan(B, layers, x.dtype.itemsize, x.dtype.itemsize,
                                tm_pref)
    grid = (B // tm,)
    kernel = functools.partial(_fused_chain_kernel, relu_flags=tuple(relu_flags))

    def build_call(single_buffer_weights):
        in_specs = [pl.BlockSpec((tm, D0), lambda i: (i, 0))]
        for w, b in layers:
            if single_buffer_weights:
                # Constant index_map -> block never changes; a single buffer
                # halves the dominant VMEM consumer (the resident weights).
                in_specs.append(pl.BlockSpec(w.shape, lambda i: (0, 0),
                                             pipeline_mode=pl.Buffered(1)))
                in_specs.append(pl.BlockSpec(b.shape, lambda i: (0, 0),
                                             pipeline_mode=pl.Buffered(1)))
            else:
                in_specs.append(pl.BlockSpec(w.shape, lambda i: (0, 0)))
                in_specs.append(pl.BlockSpec(b.shape, lambda i: (0, 0)))
        return pl.pallas_call(
            kernel,
            out_shape=jax.ShapeDtypeStruct((B, Dl), x.dtype),
            grid_spec=pltpu.PrefetchScalarGridSpec(
                num_scalar_prefetch=0,
                grid=grid,
                in_specs=in_specs,
                out_specs=pl.BlockSpec((tm, Dl), lambda i: (i, 0)),
            ),
            compiler_params=pltpu.CompilerParams(
                dimension_semantics=("parallel",),   # batch tiles -> 2 TCs on v7x
                vmem_limit_bytes=_vmem_limit(footprint),
            ),
        )

    flat_args = [x]
    for w, b in layers:
        flat_args += [w, b]
    try:
        return build_call(True)(*flat_args)
    except Exception:
        # Safety net: if single-buffering is rejected by this jax version,
        # fall back to default double-buffered resident weights.
        return build_call(False)(*flat_args)


# ---------------------------------------------------------------------------
# Path 2: per-layer tiled linear kernels (fallback for chains too big to fuse).
# ---------------------------------------------------------------------------
def _linear_k1_kernel(x_ref, w_ref, b_ref, o_ref, *, apply_relu):
    # Whole K fits in one tile: no scratch, no K grid axis.
    x = x_ref[...]
    if x.dtype != jnp.bfloat16:
        x = x.astype(jnp.bfloat16)
    out = jnp.dot(x, w_ref[...], preferred_element_type=jnp.float32)
    out = out + b_ref[...].astype(jnp.float32)
    if apply_relu:
        out = jnp.maximum(out, 0.0)
    o_ref[...] = out.astype(o_ref.dtype)


def _linear_acc_kernel(x_ref, w_ref, b_ref, o_ref, acc_ref, *, apply_relu):
    k = pl.program_id(2)

    @pl.when(k == 0)
    def _():
        acc_ref[...] = jnp.zeros_like(acc_ref)

    x = x_ref[...]
    if x.dtype != jnp.bfloat16:
        x = x.astype(jnp.bfloat16)
    acc_ref[...] += jnp.dot(x, w_ref[...], preferred_element_type=jnp.float32)

    @pl.when(k == pl.num_programs(2) - 1)
    def _():
        out = acc_ref[...] + b_ref[...].astype(jnp.float32)
        if apply_relu:
            out = jnp.maximum(out, 0.0)
        o_ref[...] = out.astype(o_ref.dtype)


def tiled_linear(x, w, b, *, apply_relu, out_dtype,
                 tm_pref=256, tn_pref=None, tk_pref=None):
    """x: [B, K], w: [K, N] bf16, b: [1, N] f32 -> [B, N] of out_dtype."""
    if tn_pref is None:
        tn_pref = _MXU_TILE_PREF
    if tk_pref is None:
        tk_pref = _MXU_TILE_PREF
    B, K = x.shape
    Kw, N = w.shape
    assert K == Kw and b.shape == (1, N)

    tm = _pick_tile(B, tm_pref, 16)
    tn = _pick_tile(N, tn_pref, 128)
    tk = _pick_tile(K, tk_pref, 128)
    nk = K // tk

    out_item = jnp.dtype(out_dtype).itemsize
    footprint = 2 * (tm * tk * x.dtype.itemsize + tk * tn * w.dtype.itemsize
                     + tn * b.dtype.itemsize + tm * tn * out_item)
    if nk > 1:
        footprint += tm * tn * 4

    if nk == 1:
        return pl.pallas_call(
            functools.partial(_linear_k1_kernel, apply_relu=apply_relu),
            out_shape=jax.ShapeDtypeStruct((B, N), out_dtype),
            grid_spec=pltpu.PrefetchScalarGridSpec(
                num_scalar_prefetch=0,
                grid=(B // tm, N // tn),
                in_specs=[pl.BlockSpec((tm, K), lambda i, j: (i, 0)),
                          pl.BlockSpec((K, tn), lambda i, j: (0, j)),
                          pl.BlockSpec((1, tn), lambda i, j: (0, j))],
                out_specs=pl.BlockSpec((tm, tn), lambda i, j: (i, j)),
            ),
            compiler_params=pltpu.CompilerParams(
                dimension_semantics=("parallel", "parallel"),
                vmem_limit_bytes=_vmem_limit(footprint),
            ),
        )(x, w, b)

    return pl.pallas_call(
        functools.partial(_linear_acc_kernel, apply_relu=apply_relu),
        out_shape=jax.ShapeDtypeStruct((B, N), out_dtype),
        grid_spec=pltpu.PrefetchScalarGridSpec(
            num_scalar_prefetch=0,
            grid=(B // tm, N // tn, nk),
            in_specs=[pl.BlockSpec((tm, tk), lambda i, j, k: (i, k)),
                      pl.BlockSpec((tk, tn), lambda i, j, k: (k, j)),
                      pl.BlockSpec((1, tn), lambda i, j, k: (0, j))],
            out_specs=pl.BlockSpec((tm, tn), lambda i, j, k: (i, j)),
            scratch_shapes=[pltpu.VMEM((tm, tn), jnp.float32)],
        ),
        compiler_params=pltpu.CompilerParams(
            dimension_semantics=("parallel", "parallel", "arbitrary"),
            vmem_limit_bytes=_vmem_limit(footprint),
        ),
    )(x, w, b)


# ---------------------------------------------------------------------------
# JAX/Pallas analogue of the PyTorch `Network` container.
# ---------------------------------------------------------------------------
class PallasNetwork:
    def __init__(self, layer_dims, key, *, w_dtype=jnp.bfloat16,
                 tm_pref=512, tn_pref=None, tk_pref=None):
        # Each "module" in modules_list is (w, b, apply_relu):
        #   w: [din, dout] bf16 (halves weight bytes, feeds the MXU bf16 path)
        #   b: [1, dout]  f32  (epilogue stays in f32)
        self.modules_list = []
        self._layer_dims = tuple(layer_dims)
        self._tm_pref = tm_pref
        self._tn_pref = tn_pref if tn_pref is not None else _MXU_TILE_PREF
        self._tk_pref = tk_pref if tk_pref is not None else _MXU_TILE_PREF
        for i, (din, dout) in enumerate(zip(layer_dims[:-1], layer_dims[1:])):
            key, kw, kb = jax.random.split(key, 3)
            scale = 1.0 / math.sqrt(din)
            w = (jax.random.uniform(kw, (din, dout), jnp.float32, -1.0, 1.0)
                 * scale).astype(w_dtype)
            b = jax.random.uniform(kb, (1, dout), jnp.float32, -1.0, 1.0) * scale
            apply_relu = i < len(layer_dims) - 2   # ReLU on all but the last layer
            self.modules_list.append((w, b, apply_relu))

    def _fused_fits(self, batch, x_itemsize):
        if not self.modules_list:
            return False
        layers = [(w, b) for w, b, _ in self.modules_list]
        _, footprint = _fused_plan(batch, layers, x_itemsize, x_itemsize,
                                   self._tm_pref)
        return footprint + 2 * _MIB <= _VMEM_BUDGET

    def forward(self, inp, *, allow_fuse=True):
        # Mirrors Network.forward: first module consumes `input`, the rest
        # consume the running activation `spk`.
        if not self.modules_list:
            return inp
        if allow_fuse and self._fused_fits(inp.shape[0], inp.dtype.itemsize):
            layers = [(w, b) for w, b, _ in self.modules_list]
            relu_flags = tuple(r for _, _, r in self.modules_list)
            return fused_mlp(inp, layers, relu_flags, tm_pref=self._tm_pref)
        # Fallback: per-layer kernels; intermediates are bf16 to halve the
        # inter-layer HBM traffic, final layer restores the input dtype.
        spk = None
        n = len(self.modules_list)
        for index, (w, b, relu) in enumerate(self.modules_list):
            src = inp if index == 0 else spk
            out_dtype = inp.dtype if index == n - 1 else jnp.bfloat16
            spk = tiled_linear(src, w, b, apply_relu=relu, out_dtype=out_dtype,
                               tm_pref=min(self._tm_pref, 256),
                               tn_pref=self._tn_pref, tk_pref=self._tk_pref)
        return spk

    # TODO(synk): save/load/load_current are checkpoint file I/O with no Pallas
    # equivalent (filesystem access); intentionally omitted.


def reference_forward(net, x):
    """Pure-JAX reference mirroring the kernel's numeric path (bf16 MXU
    operands, f32 accumulation / bias / ReLU, bf16 inter-layer activations)."""
    act = x.astype(jnp.bfloat16)
    n = len(net.modules_list)
    for i, (w, b, relu) in enumerate(net.modules_list):
        acc = jnp.dot(act, w.astype(jnp.bfloat16),
                      preferred_element_type=jnp.float32)
        acc = acc + b.astype(jnp.float32)
        if relu:
            acc = jnp.maximum(acc, 0.0)
        act = acc.astype(jnp.bfloat16) if i < n - 1 else acc
    return act.astype(x.dtype)


if __name__ == "__main__":
    key = jax.random.PRNGKey(0)
    key, kx1, kx2, kx3, kn1, kn2, kn3 = jax.random.split(key, 7)

    # --- Fused path, uniform width (batch tiled with >=2 grid steps) --------
    net1 = PallasNetwork((128, 128, 128), kn1)
    x1 = jax.random.normal(kx1, (256, 128), dtype=jnp.float32)
    out1 = jax.block_until_ready(net1.forward(x1))
    ref1 = reference_forward(net1, x1)
    assert out1.shape == (256, 128)
    assert jnp.allclose(out1, ref1, atol=2e-3, rtol=2e-3), \
        float(jnp.max(jnp.abs(out1 - ref1)))

    # --- Fused path, mixed widths (no stacking; per-layer resident weights) -
    net2 = PallasNetwork((128, 256, 128), kn2)
    x2 = jax.random.normal(kx2, (64, 128), dtype=jnp.float32)
    out2 = jax.block_until_ready(net2.forward(x2))
    ref2 = reference_forward(net2, x2)
    assert out2.shape == (64, 128)
    assert jnp.allclose(out2, ref2, atol=2e-3, rtol=2e-3), \
        float(jnp.max(jnp.abs(out2 - ref2)))

    # --- Forced fallback path: exercises the K-accumulator kernel (K=512),
    #     the K==tk specialized kernel, and bf16 intermediates. -------------
    net3 = PallasNetwork((512, 256, 128), kn3)
    x3 = jax.random.normal(kx3, (64, 512), dtype=jnp.float32)
    out3 = jax.block_until_ready(net3.forward(x3, allow_fuse=False))
    ref3 = reference_forward(net3, x3)
    assert out3.shape == (64, 128)
    assert jnp.allclose(out3, ref3, atol=2e-3, rtol=2e-3), \
        float(jnp.max(jnp.abs(out3 - ref3)))

    print("KERNEL_OK")
</pallas_src>

<mosaic_0001>
module attributes {stable_mosaic.version = 11 : i64} {
  func.func @_fused_chain_kernel(%arg0: i32, %arg1: memref<128x128xf32, #tpu.memory_space<vmem>>, %arg2: memref<128x128xbf16, #tpu.memory_space<vmem>>, %arg3: memref<1x128xf32, #tpu.memory_space<vmem>>, %arg4: memref<128x128xbf16, #tpu.memory_space<vmem>>, %arg5: memref<1x128xf32, #tpu.memory_space<vmem>>, %arg6: memref<128x128xf32, #tpu.memory_space<vmem>>) attributes {dimension_semantics = [#tpu.dimension_semantics<parallel>], iteration_bounds = array<i64: 2>, scalar_prefetch = 0 : i64, scratch_operands = 0 : i64, tpu.core_type = #tpu.core_type<tc>, window_params = [{transform_indices = @transform_0, window_bounds = array<i64: 128, 128>}, {pipeline_mode = #tpu.pipeline_mode<synchronous>, transform_indices = @transform_1, window_bounds = array<i64: 128, 128>}, {pipeline_mode = #tpu.pipeline_mode<synchronous>, transform_indices = @transform_2, window_bounds = array<i64: 1, 128>}, {pipeline_mode = #tpu.pipeline_mode<synchronous>, transform_indices = @transform_3, window_bounds = array<i64: 128, 128>}, {pipeline_mode = #tpu.pipeline_mode<synchronous>, transform_indices = @transform_4, window_bounds = array<i64: 1, 128>}, {transform_indices = @transform_5, window_bounds = array<i64: 128, 128>}]} {
    %c0 = arith.constant 0 : index
    %c0_0 = arith.constant 0 : index
    %0 = vector.load %arg1[%c0, %c0_0] : memref<128x128xf32, #tpu.memory_space<vmem>>, vector<128x128xf32>
    %1 = arith.truncf %0 : vector<128x128xf32> to vector<128x128xbf16>
    %c0_1 = arith.constant 0 : index
    %c0_2 = arith.constant 0 : index
    %2 = vector.load %arg2[%c0_1, %c0_2] : memref<128x128xbf16, #tpu.memory_space<vmem>>, vector<128x128xbf16>
    %cst = arith.constant dense<0.000000e+00> : vector<128x128xf32>
    %3 = tpu.matmul %1, %2, %cst {dimension_numbers = #tpu.dot_dimension_numbers<[1], [0], [0], [1], [0, 0, 1, 1], [], []>} : vector<128x128xbf16>, vector<128x128xbf16>, vector<128x128xf32> -> vector<128x128xf32>
    %c0_3 = arith.constant 0 : index
    %c0_4 = arith.constant 0 : index
    %4 = vector.load %arg3[%c0_3, %c0_4] : memref<1x128xf32, #tpu.memory_space<vmem>>, vector<1x128xf32>
    %5 = vector.broadcast %4 : vector<1x128xf32> to vector<128x128xf32>
    %6 = arith.addf %3, %5 : vector<128x128xf32>
    %cst_5 = arith.constant 0.000000e+00 : f32
    %7 = vector.broadcast %cst_5 : f32 to vector<128x128xf32>
    %8 = arith.maximumf %6, %7 : vector<128x128xf32>
    %9 = arith.truncf %8 : vector<128x128xf32> to vector<128x128xbf16>
    %c0_6 = arith.constant 0 : index
    %c0_7 = arith.constant 0 : index
    %10 = vector.load %arg4[%c0_6, %c0_7] : memref<128x128xbf16, #tpu.memory_space<vmem>>, vector<128x128xbf16>
    %cst_8 = arith.constant dense<0.000000e+00> : vector<128x128xf32>
    %11 = tpu.matmul %9, %10, %cst_8 {dimension_numbers = #tpu.dot_dimension_numbers<[1], [0], [0], [1], [0, 0, 1, 1], [], []>} : vector<128x128xbf16>, vector<128x128xbf16>, vector<128x128xf32> -> vector<128x128xf32>
    %c0_9 = arith.constant 0 : index
    %c0_10 = arith.constant 0 : index
    %12 = vector.load %arg5[%c0_9, %c0_10] : memref<1x128xf32, #tpu.memory_space<vmem>>, vector<1x128xf32>
    %13 = vector.broadcast %12 : vector<1x128xf32> to vector<128x128xf32>
    %14 = arith.addf %11, %13 : vector<128x128xf32>
    %c0_11 = arith.constant 0 : index
    %c0_12 = arith.constant 0 : index
    %15 = vector.load %arg6[%c0_11, %c0_12] : memref<128x128xf32, #tpu.memory_space<vmem>>, vector<128x128xf32>
    tpu.vector_store %arg6[%c0_11, %c0_12], %14 {strides = array<i32>} : memref<128x128xf32, #tpu.memory_space<vmem>>, vector<128x128xf32>,
    return
  }
  func.func @transform_0(%arg0: i32) -> (i32, i32) {
    %c0_i32 = arith.constant 0 : i32
    %c0_i32_0 = arith.constant 0 : i32
    return %arg0, %c0_i32 : i32, i32
  }
  func.func @transform_1(%arg0: i32) -> (i32, i32) {
    %c0_i32 = arith.constant 0 : i32
    %c0_i32_0 = arith.constant 0 : i32
    %c0_i32_1 = arith.constant 0 : i32
    return %c0_i32, %c0_i32_0 : i32, i32
  }
  func.func @transform_2(%arg0: i32) -> (i32, i32) {
    %c0_i32 = arith.constant 0 : i32
    %c0_i32_0 = arith.constant 0 : i32
    %c0_i32_1 = arith.constant 0 : i32
    return %c0_i32, %c0_i32_0 : i32, i32
  }
  func.func @transform_3(%arg0: i32) -> (i32, i32) {
    %c0_i32 = arith.constant 0 : i32
    %c0_i32_0 = arith.constant 0 : i32
    %c0_i32_1 = arith.constant 0 : i32
    return %c0_i32, %c0_i32_0 : i32, i32
  }
  func.func @transform_4(%arg0: i32) -> (i32, i32) {
    %c0_i32 = arith.constant 0 : i32
    %c0_i32_0 = arith.constant 0 : i32
    %c0_i32_1 = arith.constant 0 : i32
    return %c0_i32, %c0_i32_0 : i32, i32
  }
  func.func @transform_5(%arg0: i32) -> (i32, i32) {
    %c0_i32 = arith.constant 0 : i32
    %c0_i32_0 = arith.constant 0 : i32
    return %arg0, %c0_i32 : i32, i32
  }
}

module attributes {stable_mosaic.version = 11 : i64} {
  func.func @_fused_chain_kernel(%arg0: i32, %arg1: memref<128x128xf32, #tpu.memory_space<vmem>>, %arg2: memref<128x128xbf16, #tpu.memory_space<vmem>>, %arg3: memref<1x128xf32, #tpu.memory_space<vmem>>, %arg4: memref<128x128xbf16, #tpu.memory_space<vmem>>, %arg5: memref<1x128xf32, #tpu.memory_space<vmem>>, %arg6: memref<128x128xf32, #tpu.memory_space<vmem>>) attributes {dimension_semantics = [#tpu.dimension_semantics<parallel>], iteration_bounds = array<i64: 2>, scalar_prefetch = 0 : i64, scratch_operands = 0 : i64, tpu.core_type = #tpu.core_type<tc>, window_params = [{transform_indices = @transform_0, window_bounds = array<i64: 128, 128>}, {pipeline_mode = #tpu.pipeline_mode<synchronous>, transform_indices = @transform_1, window_bounds = array<i64: 128, 128>}, {pipeline_mode = #tpu.pipeline_mode<synchronous>, transform_indices = @transform_2, window_bounds = array<i64: 1, 128>}, {pipeline_mode = #tpu.pipeline_mode<synchronous>, transform_indices = @transform_3, window_bounds = array<i64: 128, 128>}, {pipeline_mode = #tpu.pipeline_mode<synchronous>, transform_indices = @transform_4, window_bounds = array<i64: 1, 128>}, {transform_indices = @transform_5, window_bounds = array<i64: 128, 128>}]} {
    %c0 = arith.constant 0 : index
    %c0_0 = arith.constant 0 : index
    %0 = vector.load %arg1[%c0, %c0_0] : memref<128x128xf32, #tpu.memory_space<vmem>>, vector<128x128xf32>
    %1 = arith.truncf %0 : vector<128x128xf32> to vector<128x128xbf16>
    %c0_1 = arith.constant 0 : index
    %c0_2 = arith.constant 0 : index
    %2 = vector.load %arg2[%c0_1, %c0_2] : memref<128x128xbf16, #tpu.memory_space<vmem>>, vector<128x128xbf16>
    %cst = arith.constant dense<0.000000e+00> : vector<128x128xf32>
    %3 = tpu.matmul %1, %2, %cst {dimension_numbers = #tpu.dot_dimension_numbers<[1], [0], [0], [1], [0, 0, 1, 1], [], []>} : vector<128x128xbf16>, vector<128x128xbf16>, vector<128x128xf32> -> vector<128x128xf32>
    %c0_3 = arith.constant 0 : index
    %c0_4 = arith.constant 0 : index
    %4 = vector.load %arg3[%c0_3, %c0_4] : memref<1x128xf32, #tpu.memory_space<vmem>>, vector<1x128xf32>
    %5 = vector.broadcast %4 : vector<1x128xf32> to vector<128x128xf32>
    %6 = arith.addf %3, %5 : vector<128x128xf32>
    %cst_5 = arith.constant 0.000000e+00 : f32
    %7 = vector.broadcast %cst_5 : f32 to vector<128x128xf32>
    %8 = arith.maximumf %6, %7 : vector<128x128xf32>
    %9 = arith.truncf %8 : vector<128x128xf32> to vector<128x128xbf16>
    %c0_6 = arith.constant 0 : index
    %c0_7 = arith.constant 0 : index
    %10 = vector.load %arg4[%c0_6, %c0_7] : memref<128x128xbf16, #tpu.memory_space<vmem>>, vector<128x128xbf16>
    %cst_8 = arith.constant dense<0.000000e+00> : vector<128x128xf32>
    %11 = tpu.matmul %9, %10, %cst_8 {dimension_numbers = #tpu.dot_dimension_numbers<[1], [0], [0], [1], [0, 0, 1, 1], [], []>} : vector<128x128xbf16>, vector<128x128xbf16>, vector<128x128xf32> -> vector<128x128xf32>
    %c0_9 = arith.constant 0 : index
    %c0_10 = arith.constant 0 : index
    %12 = vector.load %arg5[%c0_9, %c0_10] : memref<1x128xf32, #tpu.memory_space<vmem>>, vector<1x128xf32>
    %13 = vector.broadcast %12 : vector<1x128xf32> to vector<128x128xf32>
    %14 = arith.addf %11, %13 : vector<128x128xf32>
    %c0_11 = arith.constant 0 : index
    %c0_12 = arith.constant 0 : index
    %15 = vector.load %arg6[%c0_11, %c0_12] : memref<128x128xf32, #tpu.memory_space<vmem>>, vector<128x128xf32>
    tpu.vector_store %arg6[%c0_11, %c0_12], %14 {strides = array<i32>} : memref<128x128xf32, #tpu.memory_space<vmem>>, vector<128x128xf32>,
    return
  }
  func.func @transform_0(%arg0: i32) -> (i32, i32) {
    %c0_i32 = arith.constant 0 : i32
    %c0_i32_0 = arith.constant 0 : i32
    return %arg0, %c0_i32 : i32, i32
  }
  func.func @transform_1(%arg0: i32) -> (i32, i32) {
    %c0_i32 = arith.constant 0 : i32
    %c0_i32_0 = arith.constant 0 : i32
    %c0_i32_1 = arith.constant 0 : i32
    return %c0_i32, %c0_i32_0 : i32, i32
  }
  func.func @transform_2(%arg0: i32) -> (i32, i32) {
    %c0_i32 = arith.constant 0 : i32
    %c0_i32_0 = arith.constant 0 : i32
    %c0_i32_1 = arith.constant 0 : i32
    return %c0_i32, %c0_i32_0 : i32, i32
  }
  func.func @transform_3(%arg0: i32) -> (i32, i32) {
    %c0_i32 = arith.constant 0 : i32
    %c0_i32_0 = arith.constant 0 : i32
    %c0_i32_1 = arith.constant 0 : i32
    return %c0_i32, %c0_i32_0 : i32, i32
  }
  func.func @transform_4(%arg0: i32) -> (i32, i32) {
    %c0_i32 = arith.constant 0 : i32
    %c0_i32_0 = arith.constant 0 : i32
    %c0_i32_1 = arith.constant 0 : i32
    return %c0_i32, %c0_i32_0 : i32, i32
  }
  func.func @transform_5(%arg0: i32) -> (i32, i32) {
    %c0_i32 = arith.constant 0 : i32
    %c0_i32_0 = arith.constant 0 : i32
    return %arg0, %c0_i32 : i32, i32
  }
}

</mosaic_0001>

<bundles_post_ra>
// kernel: tpu_custom_call.1
= control target key start
LH: loop header
LB: loop body
LE: loop exit
PB: predicated region body
PF: predicated region fallthrough
CT: control target
= control target key end

     0   :  { %10 = vsyncpa [#allocation3], 0  ;;  %s1483_s0 = inlined_call_operand.hbm [shape: f32[256,128], index: 0, kind: input, shape index: {}]   ;;  %s1484_s1 = inlined_call_operand.hbm [shape: bf16[128,128], index: 1, kind: input, shape index: {}]   ;;  %s1485_s2 = inlined_call_operand.vmem [shape: f32[1,128], index: 2, kind: input, shape index: {}]   ;;  %s1486_s3 = inlined_call_operand.hbm [shape: bf16[128,128], index: 3, kind: input, shape index: {}]   ;;  %s1487_s4 = inlined_call_operand.vmem [shape: f32[1,128], index: 4, kind: input, shape index: {}]   ;;  %s1488_s5 = inlined_call_operand.hbm [shape: f32[256,128], index: 5, kind: output, shape index: {}]  }
   0x1   :  { %12 = vsyncpa [#allocation3 + $0x1], 0 }
   0x2   :  { %13 = vsyncpa [#allocation6], 0 }
   0x3   :  { %14 = vsyncpa [#allocation4], 0 }
   0x4   :  { %16 = vsyncpa [#allocation4 + $0x1], 0  ;;  %s1202_s18 = smov 0   ;;  %s1204_s19 = smov 0  }
   0x5   :  { %s1206_s20 = smov 0   ;;  %s1208_s21 = smov 0  }
   0x6 LB: > { %s1223_s22 = sadd.s32 4294967295, %s1160_s21   ;;  %s781_s23 = sadd.s32 4294967294, %s1160_s21   ;;  %s1160_s21 = sphi %s1208_s21, %s1508_s21   ;;  %s1156_s20 = sphi %s1206_s20, %s1507_s20   ;;  %s1152_s19 = sphi %s1204_s19, %s1506_s19   ;;  %s1148_s18 = sphi %s1202_s18, %s1505_s18  }
   0x7   : > { %p42_p0 = scmp.ne.s32.totalorder %s1152_s19, %s1148_s18  ;;  %p1489_p1 = scmp.eq.s32.totalorder %s1223_s22, 0 }
   0x8   : > { %p156_p3 = scmp.eq.s32.totalorder %s781_s23, 1  ;;  %p782_p5 = scmp.ge.s32.totalorder %s1160_s21, 1 }
   0x9   : > { %p1232_p4 = por %p1489_p1, %p42_p0  ;;  %p163_p7 = scmp.lt.s32.totalorder %s1160_s21, 3 }
   0xa   : > { %p1237_p6 = por %p156_p3, %p42_p0  ;;  %s1162_s27 = smov [#allocation5]  }
   0xb   : > { %s1492_s24 = scalar_select %p1232_p4, 1, 0 }
   0xc   : > { %s1493_s25 = scalar_select %p1237_p6, 1, 0 }
   0xd   : > { %p1242_p8 = pnand %p782_p5, %p163_p7  ;;  %s175_s28 = sshll.u32 %s1162_s27, 4  ;;  %s1246_s28 = int_to_ptr.vmem [resolvable:$true] %s175_s28 }
   0xe   : > { %s1163_s30 = smov [#allocation7]   ;;  %s1004_s9 = scalar_lea.hbm %s1484_s1, 1024 }
   0xf   : > { %p927_p9 = pneg %p1242_p8  ;;  %s191_s6 = sshll.u32 %s1163_s30, 4  ;;  %s1257_s6 = int_to_ptr.vmem [resolvable:$true] %s191_s6 }
  0x10   : > { %p1005_p12 = scmp.ne.s32.totalorder %s1484_s1, %s1004_s9  ;;  %p1011_p5 = scmp.lt.u32.totalorder %s1004_s9, %s1484_s1 }
  0x11   : > { %p1253_p11 = pnand %p927_p9, %p1489_p1 }
  0x13   : > { %p1006_p13 = pneg %p1253_p11 }
  0x15   : > { %p1007_p0 = pnand %p1006_p13, %p1005_p12 }
  0x17   : > { %p1008_p3 = pneg %p1007_p0 }
  0x19   : > { %p1013_p7 = pnand %p1011_p5, %p1008_p3 }
  0x1b   : > { %1016 = shalt.err (!%p1013_p7)
}
  0x1c   : > { %s1017_s14 = scalar_lea.vmem %s1246_s28, 1024  ;;  %p1025_p2 = scmp.lt.s32.totalorder %s1246_s28, %s1246_s28 }
  0x1d   : > { %p1018_p9 = scmp.ne.s32.totalorder %s1246_s28, %s1017_s14  ;;  %p1026_p12 = scmp.lt.s32.totalorder %s1017_s14, %s1017_s14 }
  0x1f   : > { %p1020_p10 = pnand %p1018_p9, %p1006_p13  ;;  %p1027_p0 = por %p1026_p12, %p1025_p2 }
  0x21   : > { %p1021_p1 = pneg %p1020_p10 }
  0x23   : > { %p1028_p6 = pnand %p1027_p0, %p1021_p1 }
  0x25   : > { %1031 = shalt.err (!%p1028_p6)
}
  0x26   : > { %s1164_s15 = smov 64   ;;  %s1165_s16 = smov 4  }
  0x27   : > { %930 = dma.hbm_to_vmem [thread:$0]  (!%p1253_p11), %s1484_s1, 1024, %s1246_s28, [#allocation6], %s1164_s15, %s1164_s15, %s1165_s16  }
  0x28   : > { %s1032_s7 = scalar_lea.hbm %s1486_s3, 1024 }
  0x29   : > { %p1033_p2 = scmp.ne.s32.totalorder %s1486_s3, %s1032_s7  ;;  %p1039_p10 = scmp.lt.u32.totalorder %s1032_s7, %s1486_s3 }
  0x2b   : > { %p1035_p1 = pnand %p1033_p2, %p1006_p13 }
  0x2d   : > { %p1036_p6 = pneg %p1035_p1 }
  0x2f   : > { %p1041_p3 = pnand %p1039_p10, %p1036_p6 }
  0x31   : > { %1044 = shalt.err (!%p1041_p3)
}
  0x32   : > { %s1045_s28 = scalar_lea.vmem %s1257_s6, 1024  ;;  %p1053_p12 = scmp.lt.s32.totalorder %s1257_s6, %s1257_s6 }
  0x33   : > { %p1046_p5 = scmp.ne.s32.totalorder %s1257_s6, %s1045_s28  ;;  %p1054_p0 = scmp.lt.s32.totalorder %s1045_s28, %s1045_s28 }
  0x35   : > { %p1048_p7 = pnand %p1046_p5, %p1006_p13  ;;  %p1055_p2 = por %p1054_p0, %p1053_p12 }
  0x37   : > { %p1049_p9 = pneg %p1048_p7 }
  0x39   : > { %p1056_p1 = pnand %p1055_p2, %p1049_p9 }
  0x3b   : > { %1059 = shalt.err (!%p1056_p1)
}
  0x3c   : > { %933 = dma.hbm_to_vmem [thread:$0]  (!%p1253_p11), %s1486_s3, 1024, %s1257_s6, [#allocation6], %s1164_s15, %s1164_s15, %s1165_s16  }
  0x3d   : > { %s1312_s14 = sadd.s32 1, %s1160_s21   ;;  %s29_s29 = sadd.s32 1, %s1156_s20 }
  0x3e   : > { %s26_s17 = ssub.s32 %s1160_s21, %s1312_s14  ;;  %p36_p13 = scmp.ne.s32.totalorder %s1156_s20, %s1152_s19 }
  0x3f   : > { %p27_p6 = scmp.eq.s32.totalorder %s26_s17, 0  ;;  %p37_p10 = scmp.eq.s32.totalorder %s1160_s21, 0 }
  0x40   : > { %p1496_p3 = scmp.eq.s32.totalorder %s1223_s22, 1  ;;  %p944_p7 = scmp.lt.s32.totalorder %s1160_s21, 2 }
  0x41   : > { %s1328_s27 = scalar_select %p27_p6, %s1156_s20, %s29_s29  }
  0x42   : > { %p1322_p5 = por %p1496_p3, %p36_p13  ;;  %p38_p9 = por %p37_p10, %p36_p13 }
  0x43   : > { %s208_s30 = sand.u32 1, %s1156_s20   ;;  %s817_s6 = sshll.u32 %s1160_s21, 11 }
  0x44   : > { %s1497_s23 = scalar_select %p1322_p5, 1, 0 }
  0x45   : > { %s786_s7 = sshll.u32 %s208_s30, 7  ;;  %s1335_s8 = scalar_lea.hbm %s1483_s0, %s817_s6 }
  0x46   : > { %s212_s9 = scalar_lea.vmem [#allocation2], %s786_s7  ;;  %p1339_p11 = pnand %p944_p7, %p38_p9 }
  0x47   : > { %s219_s10 = sshll.u32 %s212_s9, 4  ;;  %s1343_s28 = scalar_lea.sflag [#allocation3], %s208_s30  ;;  %s1337_s10 = int_to_ptr.vmem [resolvable:$true] %s219_s10 }
  0x48   : > { %s1060_s12 = scalar_lea.hbm %s1335_s8, 2048  ;;  %p1062_p0 = pneg %p1339_p11 }
  0x49   : > { %p1061_p12 = scmp.ne.s32.totalorder %s1335_s8, %s1060_s12  ;;  %s1065_s17 = scalar_lea.hbm %s1483_s0, 4096 }
  0x4a   : > { %p1066_p13 = scmp.lt.u32.totalorder %s1335_s8, %s1483_s0  ;;  %p1067_p6 = scmp.lt.u32.totalorder %s1065_s17, %s1060_s12 }
  0x4b   : > { %p1063_p2 = pnand %p1062_p0, %p1061_p12  ;;  %p1069_p3 = scmp.lt.u32.totalorder %s1060_s12, %s1335_s8 }
  0x4c   : > { %p1068_p10 = por %p1067_p6, %p1066_p13 }
  0x4d   : > { %p1064_p1 = pneg %p1063_p2 }
  0x4e   : > { %p1070_p7 = por %p1069_p3, %p1068_p10 }
  0x50   : > { %p1071_p9 = pnand %p1070_p7, %p1064_p1 }
  0x52   : > { %1074 = shalt.err (!%p1071_p9)
}
  0x53   : > { %s1075_s30 = scalar_lea.vmem %s1337_s10, 2048  ;;  %s1166_s15 = smov [#allocation2]  }
  0x54   : > { %p1076_p12 = scmp.ne.s32.totalorder %s1337_s10, %s1075_s30  ;;  %s1080_s16 = sshll.u32 %s1166_s15, 4  ;;  %s1081_s16 = int_to_ptr.vmem [resolvable:$false] %s1080_s16 }
  0x55   : > { %s1082_s9 = scalar_lea.vmem %s1081_s16, 4096  ;;  %p1083_p4 = scmp.lt.s32.totalorder %s1337_s10, %s1081_s16 }
  0x56   : > { %p1078_p2 = pnand %p1076_p12, %p1062_p0  ;;  %p1084_p13 = scmp.lt.s32.totalorder %s1082_s9, %s1075_s30 }
  0x58   : > { %p1079_p5 = pneg %p1078_p2  ;;  %p1085_p6 = por %p1084_p13, %p1083_p4 }
  0x5a   : > { %p1086_p10 = pnand %p1085_p6, %p1079_p5 }
  0x5c   : > { %1089 = shalt.err (!%p1086_p10)
}
  0x5d   : > { %s1167_s12 = smov 128   ;;  %s1168_s13 = smov 8  }
  0x5e   : > { %937 = dma.hbm_to_vmem [thread:$0]  (!%p1339_p11), %s1335_s8, 2048, %s1337_s10, %s1343_s28, %s1167_s12, %s1167_s12, %s1168_s13  }
  0x5f   : > { %231 = sbr.rel (%p1242_p8) target bundleno = 617 (0x269), region = 40  ;;  %s1374_s29 = sand.u32 (!%p1242_p8), 1, %s1152_s19  }
  0x60   : > { %s790_s17 = sshll.u32 (!%p1242_p8), %s1374_s29, 7  ;;  %s234_s7 = scalar_lea.sflag (!%p1242_p8), [#allocation3], %s1374_s29 }
  0x61   : > { %s1380_s6 = scalar_lea.vmem (!%p1242_p8), [#allocation2], %s790_s17  ;;  %p1499_p4 = scmp.ne.s32.totalorder (!%p1242_p8), %s1492_s24, 0 }
  0x66   : > { %1135 = dma.done.wait (%p1499_p4), %s234_s7, 2048  }
  0x67   : > { %1137 = vsyncadd (%p1499_p4), %s234_s7, 4294965248  ;;  %p1500_p5 = scmp.eq.s32.totalorder %s1223_s22, 0 }
  0x69   : > { %1139 = dma.done.wait (%p1500_p5), [#allocation6], 2048   ;;  %p1501_p8 = pmov %p1500_p5 }
  0x6a   : > { %v988_v0 = vld [vmem:[#allocation5] sm:$0xff]   ;;  %v989_v1 = vld [vmem:[#allocation5 + $0x8] sm:$0xff]   ;;  %v990_v2 = vld [vmem:[#allocation5 + $0x10] sm:$0xff]   ;;  %s1414_s11 = scalar_lea.vmem [#allocation8], %s790_s17  ;;  %s818_s28 = sshll.u32 %s1223_s22, 11 }
  0x6b   : > { %1141 = vsyncadd (%p1501_p8), [#allocation6], 4294965248  ;;  %851 = vmatprep.subr.bf16.mxu0 %v988_v0  ;;  %v991_v3 = vld [vmem:[#allocation5 + $0x18] sm:$0xff]   ;;  %v275_v4 = vld [vmem:[%s1380_s6] sm:$0xff]  ;;  %s689_s30 = sshll.u32 %s1414_s11, 4  ;;  %s1434_s9 = scalar_lea.hbm %s1488_s5, %s818_s28  ;;  %s1436_s30 = int_to_ptr.vmem [resolvable:$true] %s689_s30 }
  0x6c   : > { %852 = vmatpush3.bf16.msra.mxu0 %v988_v0  ;;  %v276_v5 = vld [vmem:[%s1380_s6 + $0x8] sm:$0xff]  ;;  %v992_v7 = vld [vmem:[#allocation5 + $0x20] sm:$0xff]   ;;  %v998_v11 = vld [vmem:[#allocation7 + $0x10] sm:$0xff]   ;;  %s676_s22 = scalar_lea.sflag [#allocation4], %s1374_s29  ;;  %s1090_s12 = scalar_lea.vmem %s1436_s30, 2048 }
  0x6d   : > { %853 = vmatprep.subr.bf16.mxu0 %v989_v1  ;;  %v291_v6 = vpack.c.bf16 %v276_v5, %v275_v4  ;;  %v996_v8 = vld [vmem:[#allocation7] sm:$0xff]   ;;  %v997_v9 = vld [vmem:[#allocation7 + $0x8] sm:$0xff]   ;;  %v994_v12 = vld [vmem:[#allocation5 + $0x30] sm:$0xff]   ;;  %p1091_p11 = scmp.ne.s32.totalorder %s1436_s30, %s1090_s12  ;;  %p1502_p0 = scmp.ne.s32.totalorder %s1497_s23, 0 }
  0x6e   : > { %v993_v10 = vld [vmem:[#allocation5 + $0x28] sm:$0xff]   ;;  %883 = vmatprep.subr.bf16.mxu1 %v996_v8  ;;  %v999_v13 = vld [vmem:[#allocation7 + $0x18] sm:$0xff]   ;;  %v1000_v15 = vld [vmem:[#allocation7 + $0x20] sm:$0xff]   ;;  %s1169_s13 = smov [#allocation8]  }
  0x6f   : > { %867 = vmatprep.mubr.bf16.mxu0 %v291_v6  ;;  %884 = vmatpush3.bf16.msra.mxu1 %v996_v8  ;;  %v995_v14 = vld [vmem:[#allocation5 + $0x38] sm:$0xff]   ;;  %v277_v16 = vld [vmem:[%s1380_s6 + $0x10] sm:$0xff]  ;;  %v279_v18 = vld [vmem:[%s1380_s6 + $0x20] sm:$0xff]  ;;  %p1092_p1 = pnand %p1091_p11, %p1502_p0  ;;  %s1094_s17 = sshll.u32 %s1169_s13, 4  ;;  %s1095_s17 = int_to_ptr.vmem [resolvable:$false] %s1094_s17 }
  0x70   : > { %854 = vmatpush3.bf16.msra.mxu0 %v989_v1  ;;  %885 = vmatprep.subr.bf16.mxu1 %v997_v9  ;;  %v278_v17 = vld [vmem:[%s1380_s6 + $0x18] sm:$0xff]  ;;  %v280_v19 = vld [vmem:[%s1380_s6 + $0x28] sm:$0xff]  ;;  %v281_v23 = vld [vmem:[%s1380_s6 + $0x30] sm:$0xff]  ;;  %s1096_s7 = scalar_lea.vmem %s1095_s17, 4096  ;;  %p1097_p7 = scmp.lt.s32.totalorder %s1436_s30, %s1095_s17 }
  0x71   : > { %855 = vmatprep.subr.bf16.mxu0 %v990_v2  ;;  %v292_v20 = vpack.c.bf16 %v278_v17, %v277_v16  ;;  %v1001_v21 = vld [vmem:[#allocation7 + $0x28] sm:$0xff]   ;;  %v293_v22 = vpack.c.bf16 %v280_v19, %v279_v18  ;;  %v282_v24 = vld [vmem:[%s1380_s6 + $0x38] sm:$0xff]  ;;  %v283_v25 = vld [vmem:[%s1380_s6 + $0x40] sm:$0xff]  ;;  %p1093_p3 = pneg %p1092_p1  ;;  %p1098_p9 = scmp.lt.s32.totalorder %s1096_s7, %s1090_s12 }
  0x72   : > { %v284_v26 = vld [vmem:[%s1380_s6 + $0x48] sm:$0xff]  ;;  %v294_v27 = vpack.c.bf16 %v282_v24, %v281_v23  ;;  %v285_v29 = vld [vmem:[%s1380_s6 + $0x50] sm:$0xff]  ;;  %v286_v30 = vld [vmem:[%s1380_s6 + $0x58] sm:$0xff] }
  0x73   : > { %886 = vmatpush3.bf16.msra.mxu1 %v997_v9  ;;  %v295_v28 = vpack.c.bf16 %v284_v26, %v283_v25  ;;  %v287_v31 = vld [vmem:[%s1380_s6 + $0x60] sm:$0xff]  ;;  %v288_v32 = vld [vmem:[%s1380_s6 + $0x68] sm:$0xff]  ;;  %v296_v33 = vpack.c.bf16 %v286_v30, %v285_v29  ;;  %v289_v35 = vld [vmem:[%s1380_s6 + $0x70] sm:$0xff]  ;;  %p1099_p12 = por %p1098_p9, %p1097_p7 }
  0x74   : > { %856 = vmatpush3.bf16.msra.mxu0 %v990_v2  ;;  %887 = vmatprep.subr.bf16.mxu1 %v998_v11  ;;  %v297_v34 = vpack.c.bf16 %v288_v32, %v287_v31  ;;  %v290_v36 = vld [vmem:[%s1380_s6 + $0x78] sm:$0xff]  ;;  %v1002_v38 = vld [vmem:[#allocation7 + $0x30] sm:$0xff]   ;;  %v794_v40 = vld [vmem:[%s1485_s2] ss:$0 sm:$0xff] }
  0x75   : > { %857 = vmatprep.subr.bf16.mxu0 %v991_v3  ;;  %v298_v37 = vpack.c.bf16 %v290_v36, %v289_v35  ;;  %v1003_v39 = vld [vmem:[#allocation7 + $0x38] sm:$0xff]   ;;  %p1100_p2 = pnand %p1099_p12, %p1093_p3 }
  0x77   : > { %888 = vmatpush3.bf16.msra.mxu1 %v998_v11 }
  0x78   : > { %858 = vmatpush3.bf16.msra.mxu0 %v991_v3  ;;  %889 = vmatprep.subr.bf16.mxu1 %v999_v13 }
  0x79   : > { %859 = vmatprep.subr.bf16.mxu0 %v992_v7 }
  0x7b   : > { %890 = vmatpush3.bf16.msra.mxu1 %v999_v13 }
  0x7c   : > { %860 = vmatpush3.bf16.msra.mxu0 %v992_v7  ;;  %891 = vmatprep.subr.bf16.mxu1 %v1000_v15 }
  0x7d   : > { %861 = vmatprep.subr.bf16.mxu0 %v993_v10 }
  0x7f   : > { %892 = vmatpush3.bf16.msra.mxu1 %v1000_v15 }
  0x80   : > { %862 = vmatpush3.bf16.msra.mxu0 %v993_v10  ;;  %893 = vmatprep.subr.bf16.mxu1 %v1001_v21 }
  0x81   : > { %863 = vmatprep.subr.bf16.mxu0 %v994_v12 }
  0x83   : > { %894 = vmatpush3.bf16.msra.mxu1 %v1001_v21 }
  0x84   : > { %864 = vmatpush3.bf16.msra.mxu0 %v994_v12  ;;  %895 = vmatprep.subr.bf16.mxu1 %v1002_v38 }
  0x85   : > { %865 = vmatprep.subr.bf16.mxu0 %v995_v14 }
  0x87   : > { %896 = vmatpush3.bf16.msra.mxu1 %v1002_v38 }
  0x88   : > { %866 = vmatpush3.bf16.msra.mxu0 %v995_v14  ;;  %897 = vmatprep.subr.bf16.mxu1 %v1003_v39 }
  0x8b   : > { %868 = vmatmul.mubr.bf16.vlgmr.msra.gmra.mrb[0].mxu0 %v292_v20  ;;  %898 = vmatpush3.bf16.msra.mxu1 %v1003_v39 }
  0x8c   : > { %871 = vmatprep.mubr.bf16.mxu0 %v293_v22 }
  0x93   : > { %872 = vmatmul.mubr.bf16.gmra.mrb[4].mxu0 %v294_v27 }
  0x94   : > { %875 = vmatprep.mubr.bf16.mxu0 %v295_v28 }
  0x9b   : > { %876 = vmatmul.mubr.bf16.gmra.mrb[8].mxu0 %v296_v33  ;;  %v803_v33 = vld [vmem:[%s1487_s4] ss:$0 sm:$0xff] }
  0x9c   : > { %879 = vmatprep.mubr.bf16.mxu0 %v297_v34 }
  0xa3   : > { %880 = vmatmul.mubr.bf16.gmra.mrb[12].mxu0 %v298_v37 }
 0x15e   : > { %v869_v41 = vpop.f32.mrb[0].mxu0 }
 0x15f   : > { %v413_v42 = vadd.f32 %v869_v41, %v794_v40  ;;  %v404_v43 = vpop.f32.mrb[1].mxu0 }
 0x160   : > { %v405_v44 = vadd.f32 %v794_v40, %v404_v43  ;;  %v870_v45 = vpop.f32.mrb[2].mxu0 }
 0x161   : > { %v416_v46 = vadd.f32 %v870_v45, %v794_v40  ;;  %v407_v47 = vpop.f32.mrb[3].mxu0  ;;  %v469_v49 = vmax.f32 %v413_v42, 0.0 }
 0x162   : > { %v408_v48 = vadd.f32 %v794_v40, %v407_v47  ;;  %v467_v51 = vmax.f32 %v405_v44, 0.0 }
 0x163   : > { %v470_v50 = vmax.f32 %v416_v46, 0.0 }
 0x164   : > { %v468_v52 = vmax.f32 %v408_v48, 0.0 }
 0x165   : > { %v484_v53 = vpack.c.bf16 %v470_v50, %v469_v49 }
 0x166   : > { %v873_v54 = vpop.f32.mrb[4].mxu0  ;;  %v483_v55 = vpack.c.bf16 %v468_v52, %v467_v51 }
 0x167   : > { %v429_v56 = vadd.f32 %v873_v54, %v794_v40  ;;  %v420_v57 = vpop.f32.mrb[5].mxu0 }
 0x168   : > { %v421_v58 = vadd.f32 %v794_v40, %v420_v57  ;;  %v874_v59 = vpop.f32.mrb[6].mxu0  ;;  %899 = vmatprep.mubr.bf16.mxu1 %v483_v55 }
 0x169   : > { %v432_v60 = vadd.f32 %v874_v59, %v794_v40  ;;  %v423_v61 = vpop.f32.mrb[7].mxu0  ;;  %900 = vmatmul.mubr.bf16.vlgmr.msra.gmra.mrb[0].mxu1 %v484_v53  ;;  %v473_v63 = vmax.f32 %v429_v56, 0.0 }
 0x16a   : > { %v424_v62 = vadd.f32 %v794_v40, %v423_v61  ;;  %v471_v1 = vmax.f32 %v421_v58, 0.0 }
 0x16b   : > { %v474_v0 = vmax.f32 %v432_v60, 0.0 }
 0x16c   : > { %v472_v2 = vmax.f32 %v424_v62, 0.0 }
 0x16d   : > { %v486_v3 = vpack.c.bf16 %v474_v0, %v473_v63 }
 0x16e   : > { %v485_v4 = vpack.c.bf16 %v472_v2, %v471_v1  ;;  %v877_v5 = vpop.f32.mrb[8].mxu0 }
 0x16f   : > { %v445_v6 = vadd.f32 %v877_v5, %v794_v40  ;;  %v436_v7 = vpop.f32.mrb[9].mxu0 }
 0x170   : > { %v437_v8 = vadd.f32 %v794_v40, %v436_v7  ;;  %v878_v9 = vpop.f32.mrb[10].mxu0  ;;  %903 = vmatprep.mubr.bf16.mxu1 %v485_v4 }
 0x171   : > { %v448_v10 = vadd.f32 %v878_v9, %v794_v40  ;;  %v439_v11 = vpop.f32.mrb[11].mxu0  ;;  %904 = vmatmul.mubr.bf16.gmra.mrb[4].mxu1 %v486_v3  ;;  %v477_v13 = vmax.f32 %v445_v6, 0.0 }
 0x172   : > { %v440_v12 = vadd.f32 %v794_v40, %v439_v11  ;;  %v475_v15 = vmax.f32 %v437_v8, 0.0 }
 0x173   : > { %v478_v14 = vmax.f32 %v448_v10, 0.0 }
 0x174   : > { %v476_v16 = vmax.f32 %v440_v12, 0.0 }
 0x175   : > { %v488_v17 = vpack.c.bf16 %v478_v14, %v477_v13 }
 0x176   : > { %v487_v18 = vpack.c.bf16 %v476_v16, %v475_v15  ;;  %v881_v19 = vpop.f32.mrb[12].mxu0 }
 0x177   : > { %v461_v20 = vadd.f32 %v881_v19, %v794_v40  ;;  %v452_v21 = vpop.f32.mrb[13].mxu0 }
 0x178   : > { %v453_v22 = vadd.f32 %v794_v40, %v452_v21  ;;  %v882_v23 = vpop.f32.mrb[14].mxu0  ;;  %907 = vmatprep.mubr.bf16.mxu1 %v487_v18 }
 0x179   : > { %v464_v24 = vadd.f32 %v882_v23, %v794_v40  ;;  %v455_v25 = vpop.f32.mrb[15].mxu0  ;;  %908 = vmatmul.mubr.bf16.gmra.mrb[8].mxu1 %v488_v17  ;;  %v481_v27 = vmax.f32 %v461_v20, 0.0 }
 0x17a   : > { %v456_v26 = vadd.f32 %v794_v40, %v455_v25  ;;  %v479_v29 = vmax.f32 %v453_v22, 0.0 }
 0x17b   : > { %v482_v28 = vmax.f32 %v464_v24, 0.0 }
 0x17c   : > { %v480_v30 = vmax.f32 %v456_v26, 0.0 }
 0x17d   : > { %v490_v31 = vpack.c.bf16 %v482_v28, %v481_v27 }
 0x17e   : > { %v489_v32 = vpack.c.bf16 %v480_v30, %v479_v29 }
 0x180   : > { %911 = vmatprep.mubr.bf16.mxu1 %v489_v32 }
 0x181   : > { %912 = vmatmul.mubr.bf16.gmra.mrb[12].mxu1 %v490_v31 }
 0x23c   : > { %v901_v34 = vpop.f32.mrb[0].mxu1 }
 0x23d   : > { %v605_v35 = vadd.f32 %v901_v34, %v803_v33  ;;  %v596_v36 = vpop.f32.mrb[1].mxu1 }
 0x23e   : > { %v597_v37 = vadd.f32 %v803_v33, %v596_v36  ;;  %v902_v38 = vpop.f32.mrb[2].mxu1 }
 0x23f   : > { %661 = vst [vmem:[%s1414_s11 + $0x10] sm:$0xff] %v605_v35  ;;  %v608_v39 = vadd.f32 %v902_v38, %v803_v33  ;;  %v599_v40 = vpop.f32.mrb[3].mxu1 }
 0x240   : > { %659 = vst [vmem:[%s1414_s11] sm:$0xff] %v597_v37  ;;  %v600_v41 = vadd.f32 %v803_v33, %v599_v40 }
 0x241   : > { %662 = vst [vmem:[%s1414_s11 + $0x18] sm:$0xff] %v608_v39 }
 0x242   : > { %660 = vst [vmem:[%s1414_s11 + $0x8] sm:$0xff] %v600_v41 }
 0x244   : > { %v905_v42 = vpop.f32.mrb[4].mxu1 }
 0x245   : > { %v621_v43 = vadd.f32 %v905_v42, %v803_v33  ;;  %v612_v44 = vpop.f32.mrb[5].mxu1 }
 0x246   : > { %v613_v45 = vadd.f32 %v803_v33, %v612_v44  ;;  %v906_v46 = vpop.f32.mrb[6].mxu1 }
 0x247   : > { %665 = vst [vmem:[%s1414_s11 + $0x30] sm:$0xff] %v621_v43  ;;  %v624_v47 = vadd.f32 %v906_v46, %v803_v33  ;;  %v615_v48 = vpop.f32.mrb[7].mxu1 }
 0x248   : > { %663 = vst [vmem:[%s1414_s11 + $0x20] sm:$0xff] %v613_v45  ;;  %v616_v49 = vadd.f32 %v803_v33, %v615_v48 }
 0x249   : > { %666 = vst [vmem:[%s1414_s11 + $0x38] sm:$0xff] %v624_v47 }
 0x24a   : > { %664 = vst [vmem:[%s1414_s11 + $0x28] sm:$0xff] %v616_v49 }
 0x24c   : > { %v909_v50 = vpop.f32.mrb[8].mxu1 }
 0x24d   : > { %v637_v51 = vadd.f32 %v909_v50, %v803_v33  ;;  %v628_v52 = vpop.f32.mrb[9].mxu1 }
 0x24e   : > { %v629_v53 = vadd.f32 %v803_v33, %v628_v52  ;;  %v910_v54 = vpop.f32.mrb[10].mxu1 }
 0x24f   : > { %669 = vst [vmem:[%s1414_s11 + $0x50] sm:$0xff] %v637_v51  ;;  %v640_v55 = vadd.f32 %v910_v54, %v803_v33  ;;  %v631_v56 = vpop.f32.mrb[11].mxu1 }
 0x250   : > { %667 = vst [vmem:[%s1414_s11 + $0x40] sm:$0xff] %v629_v53  ;;  %v632_v57 = vadd.f32 %v803_v33, %v631_v56 }
 0x251   : > { %670 = vst [vmem:[%s1414_s11 + $0x58] sm:$0xff] %v640_v55 }
 0x252   : > { %668 = vst [vmem:[%s1414_s11 + $0x48] sm:$0xff] %v632_v57 }
 0x254   : > { %v913_v58 = vpop.f32.mrb[12].mxu1 }
 0x255   : > { %v653_v59 = vadd.f32 %v913_v58, %v803_v33  ;;  %v644_v60 = vpop.f32.mrb[13].mxu1 }
 0x256   : > { %v645_v61 = vadd.f32 %v803_v33, %v644_v60  ;;  %v914_v62 = vpop.f32.mrb[14].mxu1 }
 0x257   : > { %673 = vst [vmem:[%s1414_s11 + $0x70] sm:$0xff] %v653_v59  ;;  %v656_v63 = vadd.f32 %v914_v62, %v803_v33  ;;  %v647_v0 = vpop.f32.mrb[15].mxu1 }
 0x258   : > { %671 = vst [vmem:[%s1414_s11 + $0x60] sm:$0xff] %v645_v61  ;;  %v648_v1 = vadd.f32 %v803_v33, %v647_v0 }
 0x259   : > { %674 = vst [vmem:[%s1414_s11 + $0x78] sm:$0xff] %v656_v63 }
 0x25a   : > { %672 = vst [vmem:[%s1414_s11 + $0x68] sm:$0xff] %v648_v1 }
 0x25b   : > { %1103 = shalt.err (!%p1100_p2)
}
 0x25c   : > { %s1104_s6 = scalar_lea.hbm %s1434_s9, 2048  ;;  %s1108_s8 = scalar_lea.hbm %s1488_s5, 4096 }
 0x25d   : > { %p1105_p13 = scmp.ne.s32.totalorder %s1434_s9, %s1104_s6  ;;  %p1109_p4 = scmp.lt.u32.totalorder %s1434_s9, %s1488_s5 }
 0x25e   : > { %p1110_p5 = scmp.lt.u32.totalorder %s1108_s8, %s1104_s6  ;;  %p1112_p11 = scmp.lt.u32.totalorder %s1104_s6, %s1434_s9 }
 0x25f   : > { %p1106_p6 = pnand %p1105_p13, %p1502_p0 }
 0x260   : > { %p1111_p8 = por %p1110_p5, %p1109_p4 }
 0x261   : > { %p1107_p10 = pneg %p1106_p6 }
 0x262   : > { %p1113_p1 = por %p1112_p11, %p1111_p8 }
 0x264   : > { %p1114_p3 = pnand %p1113_p1, %p1107_p10 }
 0x266   : > { %1117 = shalt.err (!%p1114_p3)
}
 0x267   : > { %s1170_s28 = smov 128   ;;  %s1171_s15 = smov 8  }
 0x268   : > { %925 = dma.vmem_to_hbm [thread:$0]  (%p1502_p0), %s1436_s30, 2048, %s1434_s9, %s676_s22, %s1170_s28, %s1170_s28, %s1171_s15  }
 0x269 PF: > { %s704_s16 = sand.u32 1, %s1148_s18   ;;  %p1503_p7 = scmp.ne.s32.totalorder %s1493_s25, 0 }
 0x26a   : > { %p1504_p9 = scmp.ge.s32.totalorder %s1160_s21, 2  ;;  %s705_s12 = scalar_lea.sflag [#allocation4], %s704_s16 }
 0x26c   : > { %p939_p12 = pnand %p1504_p9, %p1503_p7 }
 0x26e   : > { %1143 = dma.done.wait (!%p939_p12), %s705_s12, 2048  }
 0x26f   : > { %1145 = vsyncadd (!%p939_p12), %s705_s12, 4294965248  ;;  %p19_p2 = scmp.ge.s32.totalorder %s1312_s14, 4   ;;  %s1505_s18 = smov %s1152_s19 }
 0x270   : > { %s1506_s19 = smov %s1156_s20  ;;  %s1507_s20 = smov %s1328_s27 }
 0x271   : > { %s1508_s21 = smov %s1312_s14  ;;  %21 = sbr.rel (!%p19_p2) target bundleno = 6 (0x6), region = 93 }
 0x278   :  { %710 = vsyncpa [#allocation3], 1 }
 0x279   :  { %712 = vsyncpa [#allocation3 + $0x1], 1 }
 0x27a   :  { %713 = vsyncpa [#allocation6], 1 }
 0x27b   :  { %714 = vsyncpa [#allocation4], 1 }
 0x27c   :  { %716 = vsyncpa [#allocation4 + $0x1], 1 }

// kernel: tpu_custom_call.1
= control target key start
LH: loop header
LB: loop body
LE: loop exit
PB: predicated region body
PF: predicated region fallthrough
CT: control target
= control target key end

     0   :  { %10 = vsyncpa [#allocation3], 0  ;;  %s1483_s0 = inlined_call_operand.hbm [shape: f32[256,128], index: 0, kind: input, shape index: {}]   ;;  %s1484_s1 = inlined_call_operand.hbm [shape: bf16[128,128], index: 1, kind: input, shape index: {}]   ;;  %s1485_s2 = inlined_call_operand.vmem [shape: f32[1,128], index: 2, kind: input, shape index: {}]   ;;  %s1486_s3 = inlined_call_operand.hbm [shape: bf16[128,128], index: 3, kind: input, shape index: {}]   ;;  %s1487_s4 = inlined_call_operand.vmem [shape: f32[1,128], index: 4, kind: input, shape index: {}]   ;;  %s1488_s5 = inlined_call_operand.hbm [shape: f32[256,128], index: 5, kind: output, shape index: {}]  }
   0x1   :  { %12 = vsyncpa [#allocation3 + $0x1], 0 }
   0x2   :  { %13 = vsyncpa [#allocation6], 0 }
   0x3   :  { %14 = vsyncpa [#allocation4], 0 }
   0x4   :  { %16 = vsyncpa [#allocation4 + $0x1], 0  ;;  %s1202_s18 = smov 0   ;;  %s1204_s19 = smov 0  }
   0x5   :  { %s1206_s20 = smov 0   ;;  %s1208_s21 = smov 0  }
   0x6 LB: > { %s1223_s22 = sadd.s32 4294967295, %s1160_s21   ;;  %s781_s23 = sadd.s32 4294967294, %s1160_s21   ;;  %s1160_s21 = sphi %s1208_s21, %s1508_s21   ;;  %s1156_s20 = sphi %s1206_s20, %s1507_s20   ;;  %s1152_s19 = sphi %s1204_s19, %s1506_s19   ;;  %s1148_s18 = sphi %s1202_s18, %s1505_s18  }
   0x7   : > { %p42_p0 = scmp.ne.s32.totalorder %s1152_s19, %s1148_s18  ;;  %p1489_p1 = scmp.eq.s32.totalorder %s1223_s22, 0 }
   0x8   : > { %p156_p3 = scmp.eq.s32.totalorder %s781_s23, 1  ;;  %p782_p5 = scmp.ge.s32.totalorder %s1160_s21, 1 }
   0x9   : > { %p1232_p4 = por %p1489_p1, %p42_p0  ;;  %p163_p7 = scmp.lt.s32.totalorder %s1160_s21, 3 }
   0xa   : > { %p1237_p6 = por %p156_p3, %p42_p0  ;;  %s1162_s27 = smov [#allocation5]  }
   0xb   : > { %s1492_s24 = scalar_select %p1232_p4, 1, 0 }
   0xc   : > { %s1493_s25 = scalar_select %p1237_p6, 1, 0 }
   0xd   : > { %p1242_p8 = pnand %p782_p5, %p163_p7  ;;  %s175_s28 = sshll.u32 %s1162_s27, 4  ;;  %s1246_s28 = int_to_ptr.vmem [resolvable:$true] %s175_s28 }
   0xe   : > { %s1163_s30 = smov [#allocation7]   ;;  %s1004_s9 = scalar_lea.hbm %s1484_s1, 1024 }
   0xf   : > { %p927_p9 = pneg %p1242_p8  ;;  %s191_s6 = sshll.u32 %s1163_s30, 4  ;;  %s1257_s6 = int_to_ptr.vmem [resolvable:$true] %s191_s6 }
  0x10   : > { %p1005_p12 = scmp.ne.s32.totalorder %s1484_s1, %s1004_s9  ;;  %p1011_p5 = scmp.lt.u32.totalorder %s1004_s9, %s1484_s1 }
  0x11   : > { %p1253_p11 = pnand %p927_p9, %p1489_p1 }
  0x13   : > { %p1006_p13 = pneg %p1253_p11 }
  0x15   : > { %p1007_p0 = pnand %p1006_p13, %p1005_p12 }
  0x17   : > { %p1008_p3 = pneg %p1007_p0 }
  0x19   : > { %p1013_p7 = pnand %p1011_p5, %p1008_p3 }
  0x1b   : > { %1016 = shalt.err (!%p1013_p7)
}
  0x1c   : > { %s1017_s14 = scalar_lea.vmem %s1246_s28, 1024  ;;  %p1025_p2 = scmp.lt.s32.totalorder %s1246_s28, %s1246_s28 }
  0x1d   : > { %p1018_p9 = scmp.ne.s32.totalorder %s1246_s28, %s1017_s14  ;;  %p1026_p12 = scmp.lt.s32.totalorder %s1017_s14, %s1017_s14 }
  0x1f   : > { %p1020_p10 = pnand %p1018_p9, %p1006_p13  ;;  %p1027_p0 = por %p1026_p12, %p1025_p2 }
  0x21   : > { %p1021_p1 = pneg %p1020_p10 }
  0x23   : > { %p1028_p6 = pnand %p1027_p0, %p1021_p1 }
  0x25   : > { %1031 = shalt.err (!%p1028_p6)
}
  0x26   : > { %s1164_s15 = smov 64   ;;  %s1165_s16 = smov 4  }
  0x27   : > { %930 = dma.hbm_to_vmem [thread:$0]  (!%p1253_p11), %s1484_s1, 1024, %s1246_s28, [#allocation6], %s1164_s15, %s1164_s15, %s1165_s16  }
  0x28   : > { %s1032_s7 = scalar_lea.hbm %s1486_s3, 1024 }
  0x29   : > { %p1033_p2 = scmp.ne.s32.totalorder %s1486_s3, %s1032_s7  ;;  %p1039_p10 = scmp.lt.u32.totalorder %s1032_s7, %s1486_s3 }
  0x2b   : > { %p1035_p1 = pnand %p1033_p2, %p1006_p13 }
  0x2d   : > { %p1036_p6 = pneg %p1035_p1 }
  0x2f   : > { %p1041_p3 = pnand %p1039_p10, %p1036_p6 }
  0x31   : > { %1044 = shalt.err (!%p1041_p3)
}
  0x32   : > { %s1045_s28 = scalar_lea.vmem %s1257_s6, 1024  ;;  %p1053_p12 = scmp.lt.s32.totalorder %s1257_s6, %s1257_s6 }
  0x33   : > { %p1046_p5 = scmp.ne.s32.totalorder %s1257_s6, %s1045_s28  ;;  %p1054_p0 = scmp.lt.s32.totalorder %s1045_s28, %s1045_s28 }
  0x35   : > { %p1048_p7 = pnand %p1046_p5, %p1006_p13  ;;  %p1055_p2 = por %p1054_p0, %p1053_p12 }
  0x37   : > { %p1049_p9 = pneg %p1048_p7 }
  0x39   : > { %p1056_p1 = pnand %p1055_p2, %p1049_p9 }
  0x3b   : > { %1059 = shalt.err (!%p1056_p1)
}
  0x3c   : > { %933 = dma.hbm_to_vmem [thread:$0]  (!%p1253_p11), %s1486_s3, 1024, %s1257_s6, [#allocation6], %s1164_s15, %s1164_s15, %s1165_s16  }
  0x3d   : > { %s1312_s14 = sadd.s32 1, %s1160_s21   ;;  %s29_s29 = sadd.s32 1, %s1156_s20 }
  0x3e   : > { %s26_s17 = ssub.s32 %s1160_s21, %s1312_s14  ;;  %p36_p13 = scmp.ne.s32.totalorder %s1156_s20, %s1152_s19 }
  0x3f   : > { %p27_p6 = scmp.eq.s32.totalorder %s26_s17, 0  ;;  %p37_p10 = scmp.eq.s32.totalorder %s1160_s21, 0 }
  0x40   : > { %p1496_p3 = scmp.eq.s32.totalorder %s1223_s22, 1  ;;  %p944_p7 = scmp.lt.s32.totalorder %s1160_s21, 2 }
  0x41   : > { %s1328_s27 = scalar_select %p27_p6, %s1156_s20, %s29_s29  }
  0x42   : > { %p1322_p5 = por %p1496_p3, %p36_p13  ;;  %p38_p9 = por %p37_p10, %p36_p13 }
  0x43   : > { %s208_s30 = sand.u32 1, %s1156_s20   ;;  %s817_s6 = sshll.u32 %s1160_s21, 11 }
  0x44   : > { %s1497_s23 = scalar_select %p1322_p5, 1, 0 }
  0x45   : > { %s786_s7 = sshll.u32 %s208_s30, 7  ;;  %s1335_s8 = scalar_lea.hbm %s1483_s0, %s817_s6 }
  0x46   : > { %s212_s9 = scalar_lea.vmem [#allocation2], %s786_s7  ;;  %p1339_p11 = pnand %p944_p7, %p38_p9 }
  0x47   : > { %s219_s10 = sshll.u32 %s212_s9, 4  ;;  %s1343_s28 = scalar_lea.sflag [#allocation3], %s208_s30  ;;  %s1337_s10 = int_to_ptr.vmem [resolvable:$true] %s219_s10 }
  0x48   : > { %s1060_s12 = scalar_lea.hbm %s1335_s8, 2048  ;;  %p1062_p0 = pneg %p1339_p11 }
  0x49   : > { %p1061_p12 = scmp.ne.s32.totalorder %s1335_s8, %s1060_s12  ;;  %s1065_s17 = scalar_lea.hbm %s1483_s0, 4096 }
  0x4a   : > { %p1066_p13 = scmp.lt.u32.totalorder %s1335_s8, %s1483_s0  ;;  %p1067_p6 = scmp.lt.u32.totalorder %s1065_s17, %s1060_s12 }
  0x4b   : > { %p1063_p2 = pnand %p1062_p0, %p1061_p12  ;;  %p1069_p3 = scmp.lt.u32.totalorder %s1060_s12, %s1335_s8 }
  0x4c   : > { %p1068_p10 = por %p1067_p6, %p1066_p13 }
  0x4d   : > { %p1064_p1 = pneg %p1063_p2 }
  0x4e   : > { %p1070_p7 = por %p1069_p3, %p1068_p10 }
  0x50   : > { %p1071_p9 = pnand %p1070_p7, %p1064_p1 }
  0x52   : > { %1074 = shalt.err (!%p1071_p9)
}
  0x53   : > { %s1075_s30 = scalar_lea.vmem %s1337_s10, 2048  ;;  %s1166_s15 = smov [#allocation2]  }
  0x54   : > { %p1076_p12 = scmp.ne.s32.totalorder %s1337_s10, %s1075_s30  ;;  %s1080_s16 = sshll.u32 %s1166_s15, 4  ;;  %s1081_s16 = int_to_ptr.vmem [resolvable:$false] %s1080_s16 }
  0x55   : > { %s1082_s9 = scalar_lea.vmem %s1081_s16, 4096  ;;  %p1083_p4 = scmp.lt.s32.totalorder %s1337_s10, %s1081_s16 }
  0x56   : > { %p1078_p2 = pnand %p1076_p12, %p1062_p0  ;;  %p1084_p13 = scmp.lt.s32.totalorder %s1082_s9, %s1075_s30 }
  0x58   : > { %p1079_p5 = pneg %p1078_p2  ;;  %p1085_p6 = por %p1084_p13, %p1083_p4 }
  0x5a   : > { %p1086_p10 = pnand %p1085_p6, %p1079_p5 }
  0x5c   : > { %1089 = shalt.err (!%p1086_p10)
}
  0x5d   : > { %s1167_s12 = smov 128   ;;  %s1168_s13 = smov 8  }
  0x5e   : > { %937 = dma.hbm_to_vmem [thread:$0]  (!%p1339_p11), %s1335_s8, 2048, %s1337_s10, %s1343_s28, %s1167_s12, %s1167_s12, %s1168_s13  }
  0x5f   : > { %231 = sbr.rel (%p1242_p8) target bundleno = 617 (0x269), region = 40  ;;  %s1374_s29 = sand.u32 (!%p1242_p8), 1, %s1152_s19  }
  0x60   : > { %s790_s17 = sshll.u32 (!%p1242_p8), %s1374_s29, 7  ;;  %s234_s7 = scalar_lea.sflag (!%p1242_p8), [#allocation3], %s1374_s29 }
  0x61   : > { %s1380_s6 = scalar_lea.vmem (!%p1242_p8), [#allocation2], %s790_s17  ;;  %p1499_p4 = scmp.ne.s32.totalorder (!%p1242_p8), %s1492_s24, 0 }
  0x66   : > { %1135 = dma.done.wait (%p1499_p4), %s234_s7, 2048  }
  0x67   : > { %1137 = vsyncadd (%p1499_p4), %s234_s7, 4294965248  ;;  %p1500_p5 = scmp.eq.s32.totalorder %s1223_s22, 0 }
  0x69   : > { %1139 = dma.done.wait (%p1500_p5), [#allocation6], 2048   ;;  %p1501_p8 = pmov %p1500_p5 }
  0x6a   : > { %v988_v0 = vld [vmem:[#allocation5] sm:$0xff]   ;;  %v989_v1 = vld [vmem:[#allocation5 + $0x8] sm:$0xff]   ;;  %v990_v2 = vld [vmem:[#allocation5 + $0x10] sm:$0xff]   ;;  %s1414_s11 = scalar_lea.vmem [#allocation8], %s790_s17  ;;  %s818_s28 = sshll.u32 %s1223_s22, 11 }
  0x6b   : > { %1141 = vsyncadd (%p1501_p8), [#allocation6], 4294965248  ;;  %851 = vmatprep.subr.bf16.mxu0 %v988_v0  ;;  %v991_v3 = vld [vmem:[#allocation5 + $0x18] sm:$0xff]   ;;  %v275_v4 = vld [vmem:[%s1380_s6] sm:$0xff]  ;;  %s689_s30 = sshll.u32 %s1414_s11, 4  ;;  %s1434_s9 = scalar_lea.hbm %s1488_s5, %s818_s28  ;;  %s1436_s30 = int_to_ptr.vmem [resolvable:$true] %s689_s30 }
  0x6c   : > { %852 = vmatpush3.bf16.msra.mxu0 %v988_v0  ;;  %v276_v5 = vld [vmem:[%s1380_s6 + $0x8] sm:$0xff]  ;;  %v992_v7 = vld [vmem:[#allocation5 + $0x20] sm:$0xff]   ;;  %v998_v11 = vld [vmem:[#allocation7 + $0x10] sm:$0xff]   ;;  %s676_s22 = scalar_lea.sflag [#allocation4], %s1374_s29  ;;  %s1090_s12 = scalar_lea.vmem %s1436_s30, 2048 }
  0x6d   : > { %853 = vmatprep.subr.bf16.mxu0 %v989_v1  ;;  %v291_v6 = vpack.c.bf16 %v276_v5, %v275_v4  ;;  %v996_v8 = vld [vmem:[#allocation7] sm:$0xff]   ;;  %v997_v9 = vld [vmem:[#allocation7 + $0x8] sm:$0xff]   ;;  %v994_v12 = vld [vmem:[#allocation5 + $0x30] sm:$0xff]   ;;  %p1091_p11 = scmp.ne.s32.totalorder %s1436_s30, %s1090_s12  ;;  %p1502_p0 = scmp.ne.s32.totalorder %s1497_s23, 0 }
  0x6e   : > { %v993_v10 = vld [vmem:[#allocation5 + $0x28] sm:$0xff]   ;;  %883 = vmatprep.subr.bf16.mxu1 %v996_v8  ;;  %v999_v13 = vld [vmem:[#allocation7 + $0x18] sm:$0xff]   ;;  %v1000_v15 = vld [vmem:[#allocation7 + $0x20] sm:$0xff]   ;;  %s1169_s13 = smov [#allocation8]  }
  0x6f   : > { %867 = vmatprep.mubr.bf16.mxu0 %v291_v6  ;;  %884 = vmatpush3.bf16.msra.mxu1 %v996_v8  ;;  %v995_v14 = vld [vmem:[#allocation5 + $0x38] sm:$0xff]   ;;  %v277_v16 = vld [vmem:[%s1380_s6 + $0x10] sm:$0xff]  ;;  %v279_v18 = vld [vmem:[%s1380_s6 + $0x20] sm:$0xff]  ;;  %p1092_p1 = pnand %p1091_p11, %p1502_p0  ;;  %s1094_s17 = sshll.u32 %s1169_s13, 4  ;;  %s1095_s17 = int_to_ptr.vmem [resolvable:$false] %s1094_s17 }
  0x70   : > { %854 = vmatpush3.bf16.msra.mxu0 %v989_v1  ;;  %885 = vmatprep.subr.bf16.mxu1 %v997_v9  ;;  %v278_v17 = vld [vmem:[%s1380_s6 + $0x18] sm:$0xff]  ;;  %v280_v19 = vld [vmem:[%s1380_s6 + $0x28] sm:$0xff]  ;;  %v281_v23 = vld [vmem:[%s1380_s6 + $0x30] sm:$0xff]  ;;  %s1096_s7 = scalar_lea.vmem %s1095_s17, 4096  ;;  %p1097_p7 = scmp.lt.s32.totalorder %s1436_s30, %s1095_s17 }
  0x71   : > { %855 = vmatprep.subr.bf16.mxu0 %v990_v2  ;;  %v292_v20 = vpack.c.bf16 %v278_v17, %v277_v16  ;;  %v1001_v21 = vld [vmem:[#allocation7 + $0x28] sm:$0xff]   ;;  %v293_v22 = vpack.c.bf16 %v280_v19, %v279_v18  ;;  %v282_v24 = vld [vmem:[%s1380_s6 + $0x38] sm:$0xff]  ;;  %v283_v25 = vld [vmem:[%s1380_s6 + $0x40] sm:$0xff]  ;;  %p1093_p3 = pneg %p1092_p1  ;;  %p1098_p9 = scmp.lt.s32.totalorder %s1096_s7, %s1090_s12 }
  0x72   : > { %v284_v26 = vld [vmem:[%s1380_s6 + $0x48] sm:$0xff]  ;;  %v294_v27 = vpack.c.bf16 %v282_v24, %v281_v23  ;;  %v285_v29 = vld [vmem:[%s1380_s6 + $0x50] sm:$0xff]  ;;  %v286_v30 = vld [vmem:[%s1380_s6 + $0x58] sm:$0xff] }
  0x73   : > { %886 = vmatpush3.bf16.msra.mxu1 %v997_v9  ;;  %v295_v28 = vpack.c.bf16 %v284_v26, %v283_v25  ;;  %v287_v31 = vld [vmem:[%s1380_s6 + $0x60] sm:$0xff]  ;;  %v288_v32 = vld [vmem:[%s1380_s6 + $0x68] sm:$0xff]  ;;  %v296_v33 = vpack.c.bf16 %v286_v30, %v285_v29  ;;  %v289_v35 = vld [vmem:[%s1380_s6 + $0x70] sm:$0xff]  ;;  %p1099_p12 = por %p1098_p9, %p1097_p7 }
  0x74   : > { %856 = vmatpush3.bf16.msra.mxu0 %v990_v2  ;;  %887 = vmatprep.subr.bf16.mxu1 %v998_v11  ;;  %v297_v34 = vpack.c.bf16 %v288_v32, %v287_v31  ;;  %v290_v36 = vld [vmem:[%s1380_s6 + $0x78] sm:$0xff]  ;;  %v1002_v38 = vld [vmem:[#allocation7 + $0x30] sm:$0xff]   ;;  %v794_v40 = vld [vmem:[%s1485_s2] ss:$0 sm:$0xff] }
  0x75   : > { %857 = vmatprep.subr.bf16.mxu0 %v991_v3  ;;  %v298_v37 = vpack.c.bf16 %v290_v36, %v289_v35  ;;  %v1003_v39 = vld [vmem:[#allocation7 + $0x38] sm:$0xff]   ;;  %p1100_p2 = pnand %p1099_p12, %p1093_p3 }
  0x77   : > { %888 = vmatpush3.bf16.msra.mxu1 %v998_v11 }
  0x78   : > { %858 = vmatpush3.bf16.msra.mxu0 %v991_v3  ;;  %889 = vmatprep.subr.bf16.mxu1 %v999_v13 }
  0x79   : > { %859 = vmatprep.subr.bf16.mxu0 %v992_v7 }
  0x7b   : > { %890 = vmatpush3.bf16.msra.mxu1 %v999_v13 }
  0x7c   : > { %860 = vmatpush3.bf16.msra.mxu0 %v992_v7  ;;  %891 = vmatprep.subr.bf16.mxu1 %v1000_v15 }
  0x7d   : > { %861 = vmatprep.subr.bf16.mxu0 %v993_v10 }
  0x7f   : > { %892 = vmatpush3.bf16.msra.mxu1 %v1000_v15 }
  0x80   : > { %862 = vmatpush3.bf16.msra.mxu0 %v993_v10  ;;  %893 = vmatprep.subr.bf16.mxu1 %v1001_v21 }
  0x81   : > { %863 = vmatprep.subr.bf16.mxu0 %v994_v12 }
  0x83   : > { %894 = vmatpush3.bf16.msra.mxu1 %v1001_v21 }
  0x84   : > { %864 = vmatpush3.bf16.msra.mxu0 %v994_v12  ;;  %895 = vmatprep.subr.bf16.mxu1 %v1002_v38 }
  0x85   : > { %865 = vmatprep.subr.bf16.mxu0 %v995_v14 }
  0x87   : > { %896 = vmatpush3.bf16.msra.mxu1 %v1002_v38 }
  0x88   : > { %866 = vmatpush3.bf16.msra.mxu0 %v995_v14  ;;  %897 = vmatprep.subr.bf16.mxu1 %v1003_v39 }
  0x8b   : > { %868 = vmatmul.mubr.bf16.vlgmr.msra.gmra.mrb[0].mxu0 %v292_v20  ;;  %898 = vmatpush3.bf16.msra.mxu1 %v1003_v39 }
  0x8c   : > { %871 = vmatprep.mubr.bf16.mxu0 %v293_v22 }
  0x93   : > { %872 = vmatmul.mubr.bf16.gmra.mrb[4].mxu0 %v294_v27 }
  0x94   : > { %875 = vmatprep.mubr.bf16.mxu0 %v295_v28 }
  0x9b   : > { %876 = vmatmul.mubr.bf16.gmra.mrb[8].mxu0 %v296_v33  ;;  %v803_v33 = vld [vmem:[%s1487_s4] ss:$0 sm:$0xff] }
  0x9c   : > { %879 = vmatprep.mubr.bf16.mxu0 %v297_v34 }
  0xa3   : > { %880 = vmatmul.mubr.bf16.gmra.mrb[12].mxu0 %v298_v37 }
 0x15e   : > { %v869_v41 = vpop.f32.mrb[0].mxu0 }
 0x15f   : > { %v413_v42 = vadd.f32 %v869_v41, %v794_v40  ;;  %v404_v43 = vpop.f32.mrb[1].mxu0 }
 0x160   : > { %v405_v44 = vadd.f32 %v794_v40, %v404_v43  ;;  %v870_v45 = vpop.f32.mrb[2].mxu0 }
 0x161   : > { %v416_v46 = vadd.f32 %v870_v45, %v794_v40  ;;  %v407_v47 = vpop.f32.mrb[3].mxu0  ;;  %v469_v49 = vmax.f32 %v413_v42, 0.0 }
 0x162   : > { %v408_v48 = vadd.f32 %v794_v40, %v407_v47  ;;  %v467_v51 = vmax.f32 %v405_v44, 0.0 }
 0x163   : > { %v470_v50 = vmax.f32 %v416_v46, 0.0 }
 0x164   : > { %v468_v52 = vmax.f32 %v408_v48, 0.0 }
 0x165   : > { %v484_v53 = vpack.c.bf16 %v470_v50, %v469_v49 }
 0x166   : > { %v873_v54 = vpop.f32.mrb[4].mxu0  ;;  %v483_v55 = vpack.c.bf16 %v468_v52, %v467_v51 }
 0x167   : > { %v429_v56 = vadd.f32 %v873_v54, %v794_v40  ;;  %v420_v57 = vpop.f32.mrb[5].mxu0 }
 0x168   : > { %v421_v58 = vadd.f32 %v794_v40, %v420_v57  ;;  %v874_v59 = vpop.f32.mrb[6].mxu0  ;;  %899 = vmatprep.mubr.bf16.mxu1 %v483_v55 }
 0x169   : > { %v432_v60 = vadd.f32 %v874_v59, %v794_v40  ;;  %v423_v61 = vpop.f32.mrb[7].mxu0  ;;  %900 = vmatmul.mubr.bf16.vlgmr.msra.gmra.mrb[0].mxu1 %v484_v53  ;;  %v473_v63 = vmax.f32 %v429_v56, 0.0 }
 0x16a   : > { %v424_v62 = vadd.f32 %v794_v40, %v423_v61  ;;  %v471_v1 = vmax.f32 %v421_v58, 0.0 }
 0x16b   : > { %v474_v0 = vmax.f32 %v432_v60, 0.0 }
 0x16c   : > { %v472_v2 = vmax.f32 %v424_v62, 0.0 }
 0x16d   : > { %v486_v3 = vpack.c.bf16 %v474_v0, %v473_v63 }
 0x16e   : > { %v485_v4 = vpack.c.bf16 %v472_v2, %v471_v1  ;;  %v877_v5 = vpop.f32.mrb[8].mxu0 }
 0x16f   : > { %v445_v6 = vadd.f32 %v877_v5, %v794_v40  ;;  %v436_v7 = vpop.f32.mrb[9].mxu0 }
 0x170   : > { %v437_v8 = vadd.f32 %v794_v40, %v436_v7  ;;  %v878_v9 = vpop.f32.mrb[10].mxu0  ;;  %903 = vmatprep.mubr.bf16.mxu1 %v485_v4 }
 0x171   : > { %v448_v10 = vadd.f32 %v878_v9, %v794_v40  ;;  %v439_v11 = vpop.f32.mrb[11].mxu0  ;;  %904 = vmatmul.mubr.bf16.gmra.mrb[4].mxu1 %v486_v3  ;;  %v477_v13 = vmax.f32 %v445_v6, 0.0 }
 0x172   : > { %v440_v12 = vadd.f32 %v794_v40, %v439_v11  ;;  %v475_v15 = vmax.f32 %v437_v8, 0.0 }
 0x173   : > { %v478_v14 = vmax.f32 %v448_v10, 0.0 }
 0x174   : > { %v476_v16 = vmax.f32 %v440_v12, 0.0 }
 0x175   : > { %v488_v17 = vpack.c.bf16 %v478_v14, %v477_v13 }
 0x176   : > { %v487_v18 = vpack.c.bf16 %v476_v16, %v475_v15  ;;  %v881_v19 = vpop.f32.mrb[12].mxu0 }
 0x177   : > { %v461_v20 = vadd.f32 %v881_v19, %v794_v40  ;;  %v452_v21 = vpop.f32.mrb[13].mxu0 }
 0x178   : > { %v453_v22 = vadd.f32 %v794_v40, %v452_v21  ;;  %v882_v23 = vpop.f32.mrb[14].mxu0  ;;  %907 = vmatprep.mubr.bf16.mxu1 %v487_v18 }
 0x179   : > { %v464_v24 = vadd.f32 %v882_v23, %v794_v40  ;;  %v455_v25 = vpop.f32.mrb[15].mxu0  ;;  %908 = vmatmul.mubr.bf16.gmra.mrb[8].mxu1 %v488_v17  ;;  %v481_v27 = vmax.f32 %v461_v20, 0.0 }
 0x17a   : > { %v456_v26 = vadd.f32 %v794_v40, %v455_v25  ;;  %v479_v29 = vmax.f32 %v453_v22, 0.0 }
 0x17b   : > { %v482_v28 = vmax.f32 %v464_v24, 0.0 }
 0x17c   : > { %v480_v30 = vmax.f32 %v456_v26, 0.0 }
 0x17d   : > { %v490_v31 = vpack.c.bf16 %v482_v28, %v481_v27 }
 0x17e   : > { %v489_v32 = vpack.c.bf16 %v480_v30, %v479_v29 }
 0x180   : > { %911 = vmatprep.mubr.bf16.mxu1 %v489_v32 }
 0x181   : > { %912 = vmatmul.mubr.bf16.gmra.mrb[12].mxu1 %v490_v31 }
 0x23c   : > { %v901_v34 = vpop.f32.mrb[0].mxu1 }
 0x23d   : > { %v605_v35 = vadd.f32 %v901_v34, %v803_v33  ;;  %v596_v36 = vpop.f32.mrb[1].mxu1 }
 0x23e   : > { %v597_v37 = vadd.f32 %v803_v33, %v596_v36  ;;  %v902_v38 = vpop.f32.mrb[2].mxu1 }
 0x23f   : > { %661 = vst [vmem:[%s1414_s11 + $0x10] sm:$0xff] %v605_v35  ;;  %v608_v39 = vadd.f32 %v902_v38, %v803_v33  ;;  %v599_v40 = vpop.f32.mrb[3].mxu1 }
 0x240   : > { %659 = vst [vmem:[%s1414_s11] sm:$0xff] %v597_v37  ;;  %v600_v41 = vadd.f32 %v803_v33, %v599_v40 }
 0x241   : > { %662 = vst [vmem:[%s1414_s11 + $0x18] sm:$0xff] %v608_v39 }
 0x242   : > { %660 = vst [vmem:[%s1414_s11 + $0x8] sm:$0xff] %v600_v41 }
 0x244   : > { %v905_v42 = vpop.f32.mrb[4].mxu1 }
 0x245   : > { %v621_v43 = vadd.f32 %v905_v42, %v803_v33  ;;  %v612_v44 = vpop.f32.mrb[5].mxu1 }
 0x246   : > { %v613_v45 = vadd.f32 %v803_v33, %v612_v44  ;;  %v906_v46 = vpop.f32.mrb[6].mxu1 }
 0x247   : > { %665 = vst [vmem:[%s1414_s11 + $0x30] sm:$0xff] %v621_v43  ;;  %v624_v47 = vadd.f32 %v906_v46, %v803_v33  ;;  %v615_v48 = vpop.f32.mrb[7].mxu1 }
 0x248   : > { %663 = vst [vmem:[%s1414_s11 + $0x20] sm:$0xff] %v613_v45  ;;  %v616_v49 = vadd.f32 %v803_v33, %v615_v48 }
 0x249   : > { %666 = vst [vmem:[%s1414_s11 + $0x38] sm:$0xff] %v624_v47 }
 0x24a   : > { %664 = vst [vmem:[%s1414_s11 + $0x28] sm:$0xff] %v616_v49 }
 0x24c   : > { %v909_v50 = vpop.f32.mrb[8].mxu1 }
 0x24d   : > { %v637_v51 = vadd.f32 %v909_v50, %v803_v33  ;;  %v628_v52 = vpop.f32.mrb[9].mxu1 }
 0x24e   : > { %v629_v53 = vadd.f32 %v803_v33, %v628_v52  ;;  %v910_v54 = vpop.f32.mrb[10].mxu1 }
 0x24f   : > { %669 = vst [vmem:[%s1414_s11 + $0x50] sm:$0xff] %v637_v51  ;;  %v640_v55 = vadd.f32 %v910_v54, %v803_v33  ;;  %v631_v56 = vpop.f32.mrb[11].mxu1 }
 0x250   : > { %667 = vst [vmem:[%s1414_s11 + $0x40] sm:$0xff] %v629_v53  ;;  %v632_v57 = vadd.f32 %v803_v33, %v631_v56 }
 0x251   : > { %670 = vst [vmem:[%s1414_s11 + $0x58] sm:$0xff] %v640_v55 }
 0x252   : > { %668 = vst [vmem:[%s1414_s11 + $0x48] sm:$0xff] %v632_v57 }
 0x254   : > { %v913_v58 = vpop.f32.mrb[12].mxu1 }
 0x255   : > { %v653_v59 = vadd.f32 %v913_v58, %v803_v33  ;;  %v644_v60 = vpop.f32.mrb[13].mxu1 }
 0x256   : > { %v645_v61 = vadd.f32 %v803_v33, %v644_v60  ;;  %v914_v62 = vpop.f32.mrb[14].mxu1 }
 0x257   : > { %673 = vst [vmem:[%s1414_s11 + $0x70] sm:$0xff] %v653_v59  ;;  %v656_v63 = vadd.f32 %v914_v62, %v803_v33  ;;  %v647_v0 = vpop.f32.mrb[15].mxu1 }
 0x258   : > { %671 = vst [vmem:[%s1414_s11 + $0x60] sm:$0xff] %v645_v61  ;;  %v648_v1 = vadd.f32 %v803_v33, %v647_v0 }
 0x259   : > { %674 = vst [vmem:[%s1414_s11 + $0x78] sm:$0xff] %v656_v63 }
 0x25a   : > { %672 = vst [vmem:[%s1414_s11 + $0x68] sm:$0xff] %v648_v1 }
 0x25b   : > { %1103 = shalt.err (!%p1100_p2)
}
 0x25c   : > { %s1104_s6 = scalar_lea.hbm %s1434_s9, 2048  ;;  %s1108_s8 = scalar_lea.hbm %s1488_s5, 4096 }
 0x25d   : > { %p1105_p13 = scmp.ne.s32.totalorder %s1434_s9, %s1104_s6  ;;  %p1109_p4 = scmp.lt.u32.totalorder %s1434_s9, %s1488_s5 }
 0x25e   : > { %p1110_p5 = scmp.lt.u32.totalorder %s1108_s8, %s1104_s6  ;;  %p1112_p11 = scmp.lt.u32.totalorder %s1104_s6, %s1434_s9 }
 0x25f   : > { %p1106_p6 = pnand %p1105_p13, %p1502_p0 }
 0x260   : > { %p1111_p8 = por %p1110_p5, %p1109_p4 }
 0x261   : > { %p1107_p10 = pneg %p1106_p6 }
 0x262   : > { %p1113_p1 = por %p1112_p11, %p1111_p8 }
 0x264   : > { %p1114_p3 = pnand %p1113_p1, %p1107_p10 }
 0x266   : > { %1117 = shalt.err (!%p1114_p3)
}
 0x267   : > { %s1170_s28 = smov 128   ;;  %s1171_s15 = smov 8  }
 0x268   : > { %925 = dma.vmem_to_hbm [thread:$0]  (%p1502_p0), %s1436_s30, 2048, %s1434_s9, %s676_s22, %s1170_s28, %s1170_s28, %s1171_s15  }
 0x269 PF: > { %s704_s16 = sand.u32 1, %s1148_s18   ;;  %p1503_p7 = scmp.ne.s32.totalorder %s1493_s25, 0 }
 0x26a   : > { %p1504_p9 = scmp.ge.s32.totalorder %s1160_s21, 2  ;;  %s705_s12 = scalar_lea.sflag [#allocation4], %s704_s16 }
 0x26c   : > { %p939_p12 = pnand %p1504_p9, %p1503_p7 }
 0x26e   : > { %1143 = dma.done.wait (!%p939_p12), %s705_s12, 2048  }
 0x26f   : > { %1145 = vsyncadd (!%p939_p12), %s705_s12, 4294965248  ;;  %p19_p2 = scmp.ge.s32.totalorder %s1312_s14, 4   ;;  %s1505_s18 = smov %s1152_s19 }
 0x270   : > { %s1506_s19 = smov %s1156_s20  ;;  %s1507_s20 = smov %s1328_s27 }
 0x271   : > { %s1508_s21 = smov %s1312_s14  ;;  %21 = sbr.rel (!%p19_p2) target bundleno = 6 (0x6), region = 93 }
 0x278   :  { %710 = vsyncpa [#allocation3], 1 }
 0x279   :  { %712 = vsyncpa [#allocation3 + $0x1], 1 }
 0x27a   :  { %713 = vsyncpa [#allocation6], 1 }
 0x27b   :  { %714 = vsyncpa [#allocation4], 1 }
 0x27c   :  { %716 = vsyncpa [#allocation4 + $0x1], 1 }

</bundles_post_ra>
